<compile_context>
chip_gen: v7x
topology: tpu7x:2x2x1
jax: 0.10.0
libtpu: 0.0.40
codegen_flags: <defaults>
</compile_context>

<pallas_src>
import functools

import jax
import jax.numpy as jnp
from jax.experimental import pallas as pl
from jax.experimental.pallas import tpu as pltpu

_NEG = -1e30  # finite "-inf": keeps exp()/softmax NaN-free for fully padded columns


def _tarc_attention_kernel(len_ref, inp_ref, src_ref, w_in_ref, w_oc_ref, w_oi_ref,
                           out_ref, attn_ref,
                           x_ref, m_ref, l_ref, ctx_ref, s_ref,
                           *, s_tile):
    si = pl.program_id(1)
    ns = pl.num_programs(1)

    # ---- per-batch-tile init (first source tile): projection + softmax state
    @pl.when(si == 0)
    def _():
        x_ref[...] = jnp.dot(inp_ref[...], w_in_ref[...],
                             preferred_element_type=jnp.float32)
        m_ref[...] = jnp.full_like(m_ref, _NEG)
        l_ref[...] = jnp.zeros_like(l_ref)
        ctx_ref[...] = jnp.zeros_like(ctx_ref)

    src = src_ref[...].astype(jnp.float32)        # (s_tile, b_tile, Dsrc)
    x = x_ref[...]                                # (b_tile, Dsrc)

    # attention scores for this source tile
    scores = jnp.sum(src * x[None, :, :], axis=2)             # (s_tile, b_tile)

    # length mask rebuilt in-kernel (free VPU work, no (S,B) mask DMA)
    s_pos = jax.lax.broadcasted_iota(jnp.int32, scores.shape, 0) + si * s_tile
    scores = jnp.where(s_pos >= len_ref[...], _NEG, scores)

    # stash the raw (masked) scores; re-normalized once at the last step
    row = pl.multiple_of(si * s_tile, s_tile)
    s_ref[pl.ds(row, s_tile), :] = scores

    # ---- online softmax update ----------------------------------------------
    m_prev = m_ref[...]                                        # (1, b_tile)
    m_new = jnp.maximum(m_prev, jnp.max(scores, axis=0, keepdims=True))
    alpha = jnp.exp(m_prev - m_new)                            # (1, b_tile)
    p = jnp.exp(scores - m_new)                                # (s_tile, b_tile)
    l_ref[...] = alpha * l_ref[...] + jnp.sum(p, axis=0, keepdims=True)
    ctx_ref[...] = alpha.T * ctx_ref[...] + jnp.sum(p[:, :, None] * src, axis=0)
    m_ref[...] = m_new

    # ---- finalize on the last source tile ------------------------------------
    @pl.when(si == ns - 1)
    def _():
        inv_l = pl.reciprocal(l_ref[...], approx=True)         # EUP slot
        attn_ref[...] = jnp.exp(s_ref[...] - m_ref[...]) * inv_l
        ctx = ctx_ref[...] * inv_l.T                           # (b_tile, Dsrc)
        y = (jnp.dot(ctx, w_oc_ref[...], preferred_element_type=jnp.float32)
             + jnp.dot(inp_ref[...], w_oi_ref[...], preferred_element_type=jnp.float32))
        out_ref[...] = jnp.tanh(y)


def prepare_weights(w_in, w_out, source_embed_dim):
    """One-time weight prep (hoisted out of the per-call hot path).

    w_in : (Dsrc, Din) like nn.Linear.weight of input_proj
    w_out: (Dout, Din + Dsrc) like nn.Linear.weight of output_proj,
           where forward concatenates (ctx, input) in that order.
    """
    w_in_t = jnp.asarray(w_in, jnp.float32).T           # (Din, Dsrc)
    w_out_t = jnp.asarray(w_out, jnp.float32).T         # (Dsrc + Din, Dout)
    w_oc = w_out_t[:source_embed_dim]                   # (Dsrc, Dout)  (ctx part)
    w_oi = w_out_t[source_embed_dim:]                   # (Din, Dout)   (input part)
    return w_in_t, w_oc, w_oi


def _ceil_to(x, m):
    return ((x + m - 1) // m) * m


@functools.partial(jax.jit, static_argnames=("s_tile", "src_dtype"))
def tarc_attention(inp, src, lengths, w_in_t, w_oc, w_oi,
                   *, s_tile=None, src_dtype=jnp.bfloat16):
    """inp:(B,Din) f32, src:(S,B,Dsrc), lengths:(B,) int (valid source length
    per batch column; positions >= length are padding), weights from
    prepare_weights().  Returns (out (B,Dout) f32, attn (S,B) f32)."""
    B, Din = inp.shape
    S, B2, Dsrc = src.shape
    assert B2 == B
    Dout = w_oc.shape[1]

    # ---- tile selection ------------------------------------------------------
    # 128-wide batch tiles keep attention-output stores lane dense and give the
    # megacore "parallel" axis >=2 tiles; for small B a single full block avoids
    # paying per-grid-step overhead on sub-vreg work.
    b_tile = 128 if B > 128 else B
    b_pad = _ceil_to(B, b_tile)

    if s_tile is None:
        # target ~2 MiB of bf16 source per block: big enough to amortize DMA
        # setup, small enough to stay far under the v7x 64 MiB VMEM budget.
        s_tile = (2 * 1024 * 1024) // max(1, b_tile * Dsrc * jnp.dtype(src_dtype).itemsize)
    s_tile = int(min(max(int(s_tile), 1), S))
    if S >= 8:
        s_tile = max(8, (s_tile // 8) * 8)   # keep sublane-aligned tiles
    else:
        s_tile = S
    s_pad = _ceil_to(S, s_tile)

    nb = b_pad // b_tile
    ns = s_pad // s_tile

    # ---- pad + cast (padded rows/columns are masked via length) --------------
    inp_p = jnp.asarray(inp, jnp.float32)
    src_p = jnp.asarray(src, src_dtype)      # bf16 streaming, f32 accumulation
    len_p = jnp.asarray(lengths, jnp.int32)
    if b_pad != B:
        inp_p = jnp.pad(inp_p, ((0, b_pad - B), (0, 0)))
        src_p = jnp.pad(src_p, ((0, 0), (0, b_pad - B), (0, 0)))
        len_p = jnp.pad(len_p, (0, b_pad - B))          # length 0 => fully masked
    if s_pad != S:
        src_p = jnp.pad(src_p, ((0, s_pad - S), (0, 0), (0, 0)))
    len_2d = len_p.reshape(1, b_pad)

    kernel = functools.partial(_tarc_attention_kernel, s_tile=s_tile)

    out_p, attn_p = pl.pallas_call(
        kernel,
        out_shape=(jax.ShapeDtypeStruct((b_pad, Dout), jnp.float32),
                   jax.ShapeDtypeStruct((s_pad, b_pad), jnp.float32)),
        grid_spec=pltpu.PrefetchScalarGridSpec(
            num_scalar_prefetch=0,
            grid=(nb, ns),
            in_specs=[
                pl.BlockSpec((1, b_tile), lambda bi, si: (0, bi)),                # lengths
                pl.BlockSpec((b_tile, Din), lambda bi, si: (bi, 0)),              # input
                pl.BlockSpec((s_tile, b_tile, Dsrc), lambda bi, si: (si, bi, 0)), # source_hids
                pl.BlockSpec((Din, Dsrc), lambda bi, si: (0, 0)),                 # W_in^T
                pl.BlockSpec((Dsrc, Dout), lambda bi, si: (0, 0)),                # W_out^T (ctx)
                pl.BlockSpec((Din, Dout), lambda bi, si: (0, 0)),                 # W_out^T (inp)
            ],
            out_specs=(
                pl.BlockSpec((b_tile, Dout), lambda bi, si: (bi, 0)),             # out
                pl.BlockSpec((s_pad, b_tile), lambda bi, si: (0, bi)),            # attn
            ),
            scratch_shapes=[
                pltpu.VMEM((b_tile, Dsrc), jnp.float32),   # x = input_proj(input)
                pltpu.VMEM((1, b_tile), jnp.float32),      # running max  m
                pltpu.VMEM((1, b_tile), jnp.float32),      # running sum  l
                pltpu.VMEM((b_tile, Dsrc), jnp.float32),   # running context
                pltpu.VMEM((s_pad, b_tile), jnp.float32),  # raw scores (full S per batch tile)
            ],
        ),
        compiler_params=pltpu.CompilerParams(
            dimension_semantics=("parallel", "arbitrary"),
            vmem_limit_bytes=48 * 1024 * 1024,
        ),
    )(len_2d, inp_p, src_p, w_in_t, w_oc, w_oi)

    return out_p[:B], attn_p[:S, :B]


def _reference(inp, src, lengths, w_in, w_out):
    S = src.shape[0]
    x = inp @ w_in.T
    scores = jnp.sum(src * x[None, :, :], axis=2)
    mask = jnp.arange(S)[:, None] >= lengths[None, :]
    scores = jnp.where(mask, -jnp.inf, scores)
    attn = jax.nn.softmax(scores, axis=0)
    ctx = jnp.sum(attn[:, :, None] * src, axis=0)
    y = jnp.tanh(jnp.concatenate([ctx, inp], axis=1) @ w_out.T)
    return y, attn


if __name__ == "__main__":
    key = jax.random.PRNGKey(0)

    # (B, S, Din, Dsrc, Dout, s_tile_override)
    configs = [
        (8, 40, 32, 64, 48, 16),     # multi-tile online softmax + S padding (s_pad=48)
        (8, 8, 32, 32, 32, None),    # tiny single-block case (original sizes)
        (136, 24, 32, 64, 48, None), # B > 128: two "parallel" batch tiles + B padding
    ]

    for cfg_idx, (B, S, Din, Dsrc, Dout, s_tile) in enumerate(configs):
        k1, k2, k3, k4, k5 = jax.random.split(jax.random.fold_in(key, cfg_idx), 5)
        inp = jax.random.normal(k1, (B, Din), jnp.float32)
        src = jax.random.normal(k2, (S, B, Dsrc), jnp.float32)
        lengths = jax.random.randint(k3, (B,), 3, S + 1)     # valid lengths, never 0
        w_in = jax.random.uniform(k4, (Dsrc, Din), jnp.float32, -0.1, 0.1)
        w_out = jax.random.uniform(k5, (Dout, Din + Dsrc), jnp.float32, -0.1, 0.1)

        # one-time weight prep (hoisted out of the hot path)
        w_in_t, w_oc, w_oi = prepare_weights(w_in, w_out, Dsrc)

        out, attn = tarc_attention(inp, src, lengths, w_in_t, w_oc, w_oi, s_tile=s_tile)
        out, attn = jax.block_until_ready((out, attn))
        assert out.shape == (B, Dout) and attn.shape == (S, B)

        # reference uses the same bf16-rounded source so the comparison isolates
        # kernel logic (tolerance covers approx reciprocal + MXU precision).
        src_bf = src.astype(jnp.bfloat16).astype(jnp.float32)
        ref_out, ref_attn = _reference(inp, src_bf, lengths, w_in, w_out)

        assert jnp.allclose(attn, ref_attn, atol=2e-2, rtol=2e-2), \
            f"attn mismatch in config {cfg_idx}"
        assert jnp.allclose(out, ref_out, atol=2e-2, rtol=2e-2), \
            f"out mismatch in config {cfg_idx}"

    print("KERNEL_OK")
</pallas_src>

<mosaic_0001>
module attributes {stable_mosaic.version = 11 : i64} {
  func.func @_tarc_attention_kernel(%arg0: i32, %arg1: i32, %arg2: memref<1x8xi32, #tpu.memory_space<vmem>>, %arg3: memref<8x32xf32, #tpu.memory_space<vmem>>, %arg4: memref<16x8x64xbf16, #tpu.memory_space<vmem>>, %arg5: memref<32x64xf32, #tpu.memory_space<vmem>>, %arg6: memref<64x48xf32, #tpu.memory_space<vmem>>, %arg7: memref<32x48xf32, #tpu.memory_space<vmem>>, %arg8: memref<8x48xf32, #tpu.memory_space<vmem>>, %arg9: memref<48x8xf32, #tpu.memory_space<vmem>>, %arg10: memref<8x64xf32, #tpu.memory_space<vmem>>, %arg11: memref<1x8xf32, #tpu.memory_space<vmem>>, %arg12: memref<1x8xf32, #tpu.memory_space<vmem>>, %arg13: memref<8x64xf32, #tpu.memory_space<vmem>>, %arg14: memref<48x8xf32, #tpu.memory_space<vmem>>) attributes {dimension_semantics = [#tpu.dimension_semantics<parallel>, #tpu.dimension_semantics<arbitrary>], iteration_bounds = array<i64: 1, 3>, scalar_prefetch = 0 : i64, scratch_operands = 5 : i64, tpu.core_type = #tpu.core_type<tc>, window_params = [{transform_indices = @transform_0, window_bounds = array<i64: 1, 8>}, {transform_indices = @transform_1, window_bounds = array<i64: 8, 32>}, {transform_indices = @transform_2, window_bounds = array<i64: 16, 8, 64>}, {pipeline_mode = #tpu.pipeline_mode<synchronous>, transform_indices = @transform_3, window_bounds = array<i64: 32, 64>}, {pipeline_mode = #tpu.pipeline_mode<synchronous>, transform_indices = @transform_4, window_bounds = array<i64: 64, 48>}, {pipeline_mode = #tpu.pipeline_mode<synchronous>, transform_indices = @transform_5, window_bounds = array<i64: 32, 48>}, {transform_indices = @transform_6, window_bounds = array<i64: 8, 48>}, {transform_indices = @transform_7, window_bounds = array<i64: 48, 8>}]} {
    %c0_i32 = arith.constant 0 : i32
    %0 = arith.cmpi eq, %arg1, %c0_i32 : i32
    %1 = arith.extui %0 : i1 to i32
    %c0_i32_0 = arith.constant 0 : i32
    %2 = arith.cmpi ne, %1, %c0_i32_0 : i32
    scf.if %2 {
      %c0_26 = arith.constant 0 : index
      %c0_27 = arith.constant 0 : index
      %52 = vector.load %arg3[%c0_26, %c0_27] : memref<8x32xf32, #tpu.memory_space<vmem>>, vector<8x32xf32>
      %c0_28 = arith.constant 0 : index
      %c0_29 = arith.constant 0 : index
      %53 = vector.load %arg5[%c0_28, %c0_29] : memref<32x64xf32, #tpu.memory_space<vmem>>, vector<32x64xf32>
      %cst_30 = arith.constant dense<0.000000e+00> : vector<8x64xf32>
      %54 = tpu.matmul %52, %53, %cst_30 {dimension_numbers = #tpu.dot_dimension_numbers<[1], [0], [0], [1], [0, 0, 1, 1], [], []>} : vector<8x32xf32>, vector<32x64xf32>, vector<8x64xf32> -> vector<8x64xf32>
      %c0_31 = arith.constant 0 : index
      %c0_32 = arith.constant 0 : index
      %55 = vector.load %arg10[%c0_31, %c0_32] : memref<8x64xf32, #tpu.memory_space<vmem>>, vector<8x64xf32>
      tpu.vector_store %arg10[%c0_31, %c0_32], %54 {strides = array<i32>} : memref<8x64xf32, #tpu.memory_space<vmem>>, vector<8x64xf32>,
      %cst_33 = arith.constant -1.000000e+30 : f32
      %56 = vector.broadcast %cst_33 : f32 to vector<1x8xf32>
      %c0_34 = arith.constant 0 : index
      %c0_35 = arith.constant 0 : index
      %57 = vector.load %arg11[%c0_34, %c0_35] : memref<1x8xf32, #tpu.memory_space<vmem>>, vector<1x8xf32>
      tpu.vector_store %arg11[%c0_34, %c0_35], %56 {strides = array<i32>} : memref<1x8xf32, #tpu.memory_space<vmem>>, vector<1x8xf32>,
      %cst_36 = arith.constant 0.000000e+00 : f32
      %58 = vector.broadcast %cst_36 : f32 to vector<1x8xf32>
      %c0_37 = arith.constant 0 : index
      %c0_38 = arith.constant 0 : index
      %59 = vector.load %arg12[%c0_37, %c0_38] : memref<1x8xf32, #tpu.memory_space<vmem>>, vector<1x8xf32>
      tpu.vector_store %arg12[%c0_37, %c0_38], %58 {strides = array<i32>} : memref<1x8xf32, #tpu.memory_space<vmem>>, vector<1x8xf32>,
      %cst_39 = arith.constant 0.000000e+00 : f32
      %60 = vector.broadcast %cst_39 : f32 to vector<8x64xf32>
      %c0_40 = arith.constant 0 : index
      %c0_41 = arith.constant 0 : index
      %61 = vector.load %arg13[%c0_40, %c0_41] : memref<8x64xf32, #tpu.memory_space<vmem>>, vector<8x64xf32>
      tpu.vector_store %arg13[%c0_40, %c0_41], %60 {strides = array<i32>} : memref<8x64xf32, #tpu.memory_space<vmem>>, vector<8x64xf32>,
    } else {
    }
    %c0 = arith.constant 0 : index
    %c0_1 = arith.constant 0 : index
    %c0_2 = arith.constant 0 : index
    %3 = vector.load %arg4[%c0, %c0_1, %c0_2] : memref<16x8x64xbf16, #tpu.memory_space<vmem>>, vector<16x8x64xbf16>
    %4 = arith.extf %3 : vector<16x8x64xbf16> to vector<16x8x64xf32>
    %c0_3 = arith.constant 0 : index
    %c0_4 = arith.constant 0 : index
    %5 = vector.load %arg10[%c0_3, %c0_4] : memref<8x64xf32, #tpu.memory_space<vmem>>, vector<8x64xf32>
    %6 = vector.shape_cast %5 : vector<8x64xf32> to vector<1x8x64xf32>
    %7 = vector.broadcast %6 : vector<1x8x64xf32> to vector<16x8x64xf32>
    %8 = arith.mulf %4, %7 : vector<16x8x64xf32>
    %cst = arith.constant dense<0.000000e+00> : vector<16x8xf32>
    %9 = vector.multi_reduction <add>, %8, %cst [2] : vector<16x8x64xf32> to vector<16x8xf32>
    %10 = tpu.iota {dimensions = array<i32: 0>} : vector<16x8xi32>
    %c16_i32 = arith.constant 16 : i32
    %11 = arith.muli %arg1, %c16_i32 : i32
    %12 = vector.broadcast %11 : i32 to vector<16x8xi32>
    %13 = arith.addi %10, %12 : vector<16x8xi32>
    %c0_5 = arith.constant 0 : index
    %c0_6 = arith.constant 0 : index
    %14 = vector.load %arg2[%c0_5, %c0_6] : memref<1x8xi32, #tpu.memory_space<vmem>>, vector<1x8xi32>
    %15 = vector.broadcast %14 : vector<1x8xi32> to vector<16x8xi32>
    %16 = arith.cmpi sge, %13, %15 : vector<16x8xi32>
    %cst_7 = arith.constant -1.000000e+30 : f32
    %17 = vector.broadcast %cst_7 : f32 to vector<16x8xf32>
    %18 = arith.select %16, %17, %9 : vector<16x8xi1>, vector<16x8xf32>
    %c16_i32_8 = arith.constant 16 : i32
    %19 = arith.muli %arg1, %c16_i32_8 : i32
    %20 = tpu.assume_multiple %19, 16 : i32
    %21 = arith.index_cast %20 : i32 to index
    %c0_9 = arith.constant 0 : index
    %22 = vector.load %arg14[%21, %c0_9] : memref<48x8xf32, #tpu.memory_space<vmem>>, vector<16x8xf32>
    tpu.vector_store %arg14[%21, %c0_9], %18 {strides = array<i32>} : memref<48x8xf32, #tpu.memory_space<vmem>>, vector<16x8xf32>,
    %c0_10 = arith.constant 0 : index
    %c0_11 = arith.constant 0 : index
    %23 = vector.load %arg11[%c0_10, %c0_11] : memref<1x8xf32, #tpu.memory_space<vmem>>, vector<1x8xf32>
    %cst_12 = arith.constant dense<0xFF800000> : vector<8xf32>
    %24 = vector.multi_reduction <maximumf>, %18, %cst_12 [0] : vector<16x8xf32> to vector<8xf32>
    %25 = vector.shape_cast %24 : vector<8xf32> to vector<1x8xf32>
    %26 = arith.maximumf %23, %25 : vector<1x8xf32>
    %27 = arith.subf %23, %26 : vector<1x8xf32>
    %28 = math.exp %27 : vector<1x8xf32>
    %29 = vector.broadcast %26 : vector<1x8xf32> to vector<16x8xf32>
    %30 = arith.subf %18, %29 : vector<16x8xf32>
    %31 = math.exp %30 : vector<16x8xf32>
    %c0_13 = arith.constant 0 : index
    %c0_14 = arith.constant 0 : index
    %32 = vector.load %arg12[%c0_13, %c0_14] : memref<1x8xf32, #tpu.memory_space<vmem>>, vector<1x8xf32>
    %33 = arith.mulf %28, %32 : vector<1x8xf32>
    %cst_15 = arith.constant dense<0.000000e+00> : vector<8xf32>
    %34 = vector.multi_reduction <add>, %31, %cst_15 [0] : vector<16x8xf32> to vector<8xf32>
    %35 = vector.shape_cast %34 : vector<8xf32> to vector<1x8xf32>
    %36 = arith.addf %33, %35 : vector<1x8xf32>
    %c0_16 = arith.constant 0 : index
    %c0_17 = arith.constant 0 : index
    %37 = vector.load %arg12[%c0_16, %c0_17] : memref<1x8xf32, #tpu.memory_space<vmem>>, vector<1x8xf32>
    tpu.vector_store %arg12[%c0_16, %c0_17], %36 {strides = array<i32>} : memref<1x8xf32, #tpu.memory_space<vmem>>, vector<1x8xf32>,
    %38 = tpu.transpose %28, [1, 0] : vector<1x8xf32> -> vector<8x1xf32>
    %c0_18 = arith.constant 0 : index
    %c0_19 = arith.constant 0 : index
    %39 = vector.load %arg13[%c0_18, %c0_19] : memref<8x64xf32, #tpu.memory_space<vmem>>, vector<8x64xf32>
    %40 = vector.broadcast %38 : vector<8x1xf32> to vector<8x64xf32>
    %41 = arith.mulf %40, %39 : vector<8x64xf32>
    %42 = vector.shape_cast %31 : vector<16x8xf32> to vector<16x8x1xf32>
    %43 = vector.broadcast %42 : vector<16x8x1xf32> to vector<16x8x64xf32>
    %44 = arith.mulf %43, %4 : vector<16x8x64xf32>
    %cst_20 = arith.constant dense<0.000000e+00> : vector<8x64xf32>
    %45 = vector.multi_reduction <add>, %44, %cst_20 [0] : vector<16x8x64xf32> to vector<8x64xf32>
    %46 = arith.addf %41, %45 : vector<8x64xf32>
    %c0_21 = arith.constant 0 : index
    %c0_22 = arith.constant 0 : index
    %47 = vector.load %arg13[%c0_21, %c0_22] : memref<8x64xf32, #tpu.memory_space<vmem>>, vector<8x64xf32>
    tpu.vector_store %arg13[%c0_21, %c0_22], %46 {strides = array<i32>} : memref<8x64xf32, #tpu.memory_space<vmem>>, vector<8x64xf32>,
    %c0_23 = arith.constant 0 : index
    %c0_24 = arith.constant 0 : index
    %48 = vector.load %arg11[%c0_23, %c0_24] : memref<1x8xf32, #tpu.memory_space<vmem>>, vector<1x8xf32>
    tpu.vector_store %arg11[%c0_23, %c0_24], %26 {strides = array<i32>} : memref<1x8xf32, #tpu.memory_space<vmem>>, vector<1x8xf32>,
    %c2_i32 = arith.constant 2 : i32
    %49 = arith.cmpi eq, %arg1, %c2_i32 : i32
    %50 = arith.extui %49 : i1 to i32
    %c0_i32_25 = arith.constant 0 : i32
    %51 = arith.cmpi ne, %50, %c0_i32_25 : i32
    scf.if %51 {
      %c0_26 = arith.constant 0 : index
      %c0_27 = arith.constant 0 : index
      %52 = vector.load %arg12[%c0_26, %c0_27] : memref<1x8xf32, #tpu.memory_space<vmem>>, vector<1x8xf32>
      %53 = tpu.reciprocal %52 {approx = true} : vector<1x8xf32> -> vector<1x8xf32>
      %c0_28 = arith.constant 0 : index
      %c0_29 = arith.constant 0 : index
      %54 = vector.load %arg14[%c0_28, %c0_29] : memref<48x8xf32, #tpu.memory_space<vmem>>, vector<48x8xf32>
      %c0_30 = arith.constant 0 : index
      %c0_31 = arith.constant 0 : index
      %55 = vector.load %arg11[%c0_30, %c0_31] : memref<1x8xf32, #tpu.memory_space<vmem>>, vector<1x8xf32>
      %56 = vector.broadcast %55 : vector<1x8xf32> to vector<48x8xf32>
      %57 = arith.subf %54, %56 : vector<48x8xf32>
      %58 = math.exp %57 : vector<48x8xf32>
      %59 = vector.broadcast %53 : vector<1x8xf32> to vector<48x8xf32>
      %60 = arith.mulf %58, %59 : vector<48x8xf32>
      %c0_32 = arith.constant 0 : index
      %c0_33 = arith.constant 0 : index
      %61 = vector.load %arg9[%c0_32, %c0_33] : memref<48x8xf32, #tpu.memory_space<vmem>>, vector<48x8xf32>
      tpu.vector_store %arg9[%c0_32, %c0_33], %60 {strides = array<i32>} : memref<48x8xf32, #tpu.memory_space<vmem>>, vector<48x8xf32>,
      %c0_34 = arith.constant 0 : index
      %c0_35 = arith.constant 0 : index
      %62 = vector.load %arg13[%c0_34, %c0_35] : memref<8x64xf32, #tpu.memory_space<vmem>>, vector<8x64xf32>
      %63 = tpu.transpose %53, [1, 0] : vector<1x8xf32> -> vector<8x1xf32>
      %64 = vector.broadcast %63 : vector<8x1xf32> to vector<8x64xf32>
      %65 = arith.mulf %62, %64 : vector<8x64xf32>
      %c0_36 = arith.constant 0 : index
      %c0_37 = arith.constant 0 : index
      %66 = vector.load %arg6[%c0_36, %c0_37] : memref<64x48xf32, #tpu.memory_space<vmem>>, vector<64x48xf32>
      %cst_38 = arith.constant dense<0.000000e+00> : vector<8x48xf32>
      %67 = tpu.matmul %65, %66, %cst_38 {dimension_numbers = #tpu.dot_dimension_numbers<[1], [0], [0], [1], [0, 0, 1, 1], [], []>} : vector<8x64xf32>, vector<64x48xf32>, vector<8x48xf32> -> vector<8x48xf32>
      %c0_39 = arith.constant 0 : index
      %c0_40 = arith.constant 0 : index
      %68 = vector.load %arg3[%c0_39, %c0_40] : memref<8x32xf32, #tpu.memory_space<vmem>>, vector<8x32xf32>
      %c0_41 = arith.constant 0 : index
      %c0_42 = arith.constant 0 : index
      %69 = vector.load %arg7[%c0_41, %c0_42] : memref<32x48xf32, #tpu.memory_space<vmem>>, vector<32x48xf32>
      %cst_43 = arith.constant dense<0.000000e+00> : vector<8x48xf32>
      %70 = tpu.matmul %68, %69, %cst_43 {dimension_numbers = #tpu.dot_dimension_numbers<[1], [0], [0], [1], [0, 0, 1, 1], [], []>} : vector<8x32xf32>, vector<32x48xf32>, vector<8x48xf32> -> vector<8x48xf32>
      %71 = arith.addf %67, %70 : vector<8x48xf32>
      %72 = math.tanh %71 : vector<8x48xf32>
      %c0_44 = arith.constant 0 : index
      %c0_45 = arith.constant 0 : index
      %73 = vector.load %arg8[%c0_44, %c0_45] : memref<8x48xf32, #tpu.memory_space<vmem>>, vector<8x48xf32>
      tpu.vector_store %arg8[%c0_44, %c0_45], %72 {strides = array<i32>} : memref<8x48xf32, #tpu.memory_space<vmem>>, vector<8x48xf32>,
    } else {
    }
    return
  }
  func.func @transform_0(%arg0: i32, %arg1: i32) -> (i32, i32) {
    %c0_i32 = arith.constant 0 : i32
    %c0_i32_0 = arith.constant 0 : i32
    return %c0_i32, %arg0 : i32, i32
  }
  func.func @transform_1(%arg0: i32, %arg1: i32) -> (i32, i32) {
    %c0_i32 = arith.constant 0 : i32
    %c0_i32_0 = arith.constant 0 : i32
    return %arg0, %c0_i32 : i32, i32
  }
  func.func @transform_2(%arg0: i32, %arg1: i32) -> (i32, i32, i32) {
    %c0_i32 = arith.constant 0 : i32
    %c0_i32_0 = arith.constant 0 : i32
    return %arg1, %arg0, %c0_i32 : i32, i32, i32
  }
  func.func @transform_3(%arg0: i32, %arg1: i32) -> (i32, i32) {
    %c0_i32 = arith.constant 0 : i32
    %c0_i32_0 = arith.constant 0 : i32
    %c0_i32_1 = arith.constant 0 : i32
    return %c0_i32, %c0_i32_0 : i32, i32
  }
  func.func @transform_4(%arg0: i32, %arg1: i32) -> (i32, i32) {
    %c0_i32 = arith.constant 0 : i32
    %c0_i32_0 = arith.constant 0 : i32
    %c0_i32_1 = arith.constant 0 : i32
    return %c0_i32, %c0_i32_0 : i32, i32
  }
  func.func @transform_5(%arg0: i32, %arg1: i32) -> (i32, i32) {
    %c0_i32 = arith.constant 0 : i32
    %c0_i32_0 = arith.constant 0 : i32
    %c0_i32_1 = arith.constant 0 : i32
    return %c0_i32, %c0_i32_0 : i32, i32
  }
  func.func @transform_6(%arg0: i32, %arg1: i32) -> (i32, i32) {
    %c0_i32 = arith.constant 0 : i32
    %c0_i32_0 = arith.constant 0 : i32
    return %arg0, %c0_i32 : i32, i32
  }
  func.func @transform_7(%arg0: i32, %arg1: i32) -> (i32, i32) {
    %c0_i32 = arith.constant 0 : i32
    %c0_i32_0 = arith.constant 0 : i32
    return %c0_i32, %arg0 : i32, i32
  }
}

</mosaic_0001>

<bundles_post_ra>
// kernel: tarc_attention.1
= control target key start
LH: loop header
LB: loop body
LE: loop exit
PB: predicated region body
PF: predicated region fallthrough
CT: control target
= control target key end

     0   :  { %13 = vsyncpa [#allocation8], 0  ;;  %s1581_s24 = smov 0   ;;  %s1583_s25 = smov 0   ;;  %s1927_s0 = inlined_call_operand.vmem [shape: s32[1,8], index: 0, kind: input, shape index: {}]   ;;  %s1928_s1 = inlined_call_operand.vmem [shape: f32[8,32], index: 1, kind: input, shape index: {}]   ;;  %s1929_s2 = inlined_call_operand.vmem [shape: bf16[48,8,64], index: 2, kind: input, shape index: {}]   ;;  %s1930_s3 = inlined_call_operand.vmem [shape: f32[32,64], index: 3, kind: input, shape index: {}]   ;;  %s1931_s4 = inlined_call_operand.vmem [shape: f32[64,48], index: 4, kind: input, shape index: {}]   ;;  %s1932_s5 = inlined_call_operand.vmem [shape: f32[32,48], index: 5, kind: input, shape index: {}]   ;;  %s1933_s6 = inlined_call_operand.hbm [shape: f32[8,48], index: 6, kind: output, shape index: {0}]   ;;  %s1934_s7 = inlined_call_operand.vmem [shape: f32[48,8], index: 7, kind: output, shape index: {1}]  }
   0x1   :  { %s1585_s26 = smov 0  }
   0x2 LB: > { %s1266_s27 = sadd.s32 4294967295, %s1529_s26   ;;  %s28_s28 = sadd.s32 1, %s1525_s25  ;;  %s1529_s26 = sphi %s1585_s26, %s19_s26   ;;  %s1525_s25 = sphi %s1583_s25, %s1937_s25   ;;  %s1521_s24 = sphi %s1581_s24, %s1936_s24  }
   0x3   : > { %p29_p0 = scmp.ge.s32.totalorder %s28_s28, 3  ;;  %p1271_p1 = scmp.ge.s32.totalorder %s1529_s26, 1 }
   0x4   : > { %p276_p2 = scmp.lt.s32.totalorder %s1529_s26, 4 }
   0x5   : > { %s1939_s28 = smov (%p29_p0, %s28_s28), 0 }
   0x6   : > { %p277_p3 = pnand %p1271_p1, %p276_p2 }
   0x7   : > { %s1603_s29 = sshll.u32 (!%p277_p3), %s1521_s24, 4  ;;  %p1274_p5 = scmp.ne.s32.totalorder (!%p277_p3), %s1521_s24, 0 }
   0x8   : > { %280 = sbr.rel (%p277_p3) target bundleno = 1148 (0x47c), region = 44  ;;  %p325_p4 = scmp.lt.s32.totalorder (!%p277_p3), %s1603_s29, 47 }
   0xf   : > { %s326_s30 = scalar_select %p325_p4, %s1603_s29, 47 }
  0x10   : > { %340 = sbr.rel (%p1274_p5) target bundleno = 239 (0xef), region = 48  ;;  %v342_v0 = vld [vmem:[%s1930_s3] sm:$0xff] (!%p1274_p5)  ;;  %v343_v1 = vld [vmem:[%s1930_s3 + $0x8] sm:$0xff] (!%p1274_p5)  ;;  %v344_v2 = vld [vmem:[%s1930_s3 + $0x10] sm:$0xff] (!%p1274_p5)  ;;  %v1531_v3 = vmov (!%p1274_p5), 0.0|0.0   ;;  %vm1532_vm0 = vmmov (!%p1274_p5), 0  }
  0x11   : > { %s1273_s8 = sshll.u32 %s326_s30, 2  ;;  %1386 = vmatprep.subr.bf16.mxu0 (!%p1274_p5), %v1531_v3  ;;  %v1387_v4 = vpack.c.bf16 (!%p1274_p5), %v343_v1, %v342_v0  ;;  %v345_v5 = vld [vmem:[%s1930_s3 + $0x18] sm:$0xff] (!%p1274_p5)  ;;  %v1533_v6 = vmov (!%p1274_p5), 0.0   ;;  %vm422_vm1 = vcmask (!%p1274_p5), 57344   ;;  %v1534_v7 = vmov (!%p1274_p5), -1e+30  }
  0x12   : > { %s1610_s11 = scalar_lea.vmem %s1929_s2, %s1273_s8  ;;  %1353 = vmatprep.mubr.msk.f32.mxu0 (!%p1274_p5), %vm1532_vm0, %v1533_v6  ;;  %423 = vst.msk [vmem:[#allocation3] sm:$0x1] (!%p1274_p5), %vm422_vm1, %v1534_v7  ;;  %424 = vst.msk [vmem:[#allocation4] sm:$0x1] (!%p1274_p5), %vm422_vm1, %v1533_v6  ;;  %v1390_v8 = vpack.c.bf16 (!%p1274_p5), %v345_v5, %v344_v2  ;;  %v341_v9 = vld [vmem:[%s1928_s1] sm:$0xff] (!%p1274_p5)  ;;  %vm346_vm2 = vcmask (!%p1274_p5), 261120  }
  0x13   : > { %1388 = vmatpush3.bf16.msra.mxu0 (!%p1274_p5), %v1387_v4  ;;  %vm420_vm3 = vcmask (!%p1274_p5), 523264  }
  0x14   : > { %1389 = vmatprep.subr.bf16.mxu0 (!%p1274_p5), %v1531_v3  ;;  %425 = vst.msk [vmem:[#allocation5] sm:$0xff] (!%p1274_p5), %vm420_vm3, %v1533_v6 }
  0x17   : > { %1391 = vmatpush3.bf16.msra.mxu0 %v1390_v8 }
  0x1a   : > { %1354 = vmatmul.mubr.msk.f32.vlgmr.msra.gmra.mrb[0].mxu0 %vm346_vm2, %v341_v9 }
  0xed   : > { %v416_v10 = vpop.f32.mrb[0].mxu0 }
  0xee   : > { %421 = vst.msk [vmem:[#allocation2] sm:$0xff] %vm420_vm3, %v416_v10  ;;  %v1355_v11 = vpop.f32.mrb[1].mxu0 }
  0xef PF: > { %v1629_v12 = vld [vmem:[%s1610_s11 + $0x20] sm:$0xff]   ;;  %v1641_v19 = vld [vmem:[%s1610_s11 + $0x28] sm:$0xff]   ;;  %vm475_vm4 = vcmask 523264   ;;  %v1673_v35 = vld [vmem:[%s1610_s11 + $0x30] sm:$0xff]   ;;  %v524_v11 = vlaneseq  ;;  %vm620_vm5 = vcmask 1041409   ;;  %vm622_vm6 = vcmask 1042434  }
  0xf0   : > { %v1634_v14 = vld [vmem:[%s1610_s11] sm:$0xff]   ;;  %v1305_v15 = vunpack.c.l.bf16 %v1629_v12  ;;  %v1306_v17 = vunpack.c.h.bf16 %v1629_v12  ;;  %v1644_v20 = vld [vmem:[%s1610_s11 + $0x8] sm:$0xff]   ;;  %v1309_v21 = vunpack.c.l.bf16 %v1641_v19  ;;  %v1310_v29 = vunpack.c.h.bf16 %v1641_v19  ;;  %v1676_v36 = vld [vmem:[%s1610_s11 + $0x10] sm:$0xff]   ;;  %s645_s30 = scalar_lea.vmem [#allocation6], %s1603_s29  ;;  %p1278_p6 = scmp.ne.s32.totalorder %s1521_s24, 2 }
  0xf1   : > { %v1289_v16 = vunpack.c.l.bf16 %v1634_v14  ;;  %v1290_v18 = vunpack.c.h.bf16 %v1634_v14  ;;  %v1293_v22 = vunpack.c.l.bf16 %v1644_v20  ;;  %v1294_v30 = vunpack.c.h.bf16 %v1644_v20  ;;  %v1699_v49 = vld [vmem:[%s1610_s11 + $0x38] sm:$0xff]  }
  0xf2   : > { %v1313_v41 = vunpack.c.l.bf16 %v1673_v35  ;;  %v1297_v42 = vunpack.c.l.bf16 %v1676_v36  ;;  %v1314_v47 = vunpack.c.h.bf16 %v1673_v35  ;;  %v1298_v48 = vunpack.c.h.bf16 %v1676_v36  ;;  %v1702_v50 = vld [vmem:[%s1610_s11 + $0x18] sm:$0xff]  }
  0xf3   : > { %v1317_v51 = vunpack.c.l.bf16 %v1699_v49  ;;  %v1301_v52 = vunpack.c.l.bf16 %v1702_v50  ;;  %v1318_v57 = vunpack.c.h.bf16 %v1699_v49  ;;  %v1302_v58 = vunpack.c.h.bf16 %v1702_v50 }
  0xf4   : > { %vm624_vm7 = vcmask 1043459   ;;  %vm626_vm8 = vcmask 1044484   ;;  %vm628_vm9 = vcmask 1045509   ;;  %vm630_vm10 = vcmask 1046534  }
  0xf5   : > { %v1631_v13 = vld [vmem:[#allocation2] sm:$0xff]  ;;  %vm632_vm11 = vcmask 1047559   ;;  %vm646_vm14 = vcmask 64512   ;;  %vm687_vm15 = vcmask 57344   ;;  %vm1538_vm0 = vmmov (!%p1278_p6), 0  }
  0xf6   : > { %v467_v23 = vmul.f32 %v1305_v15, %v1631_v13  ;;  %v459_v24 = vmul.f32 %v1289_v16, %v1631_v13  ;;  %v468_v25 = vmul.f32 %v1306_v17, %v1631_v13  ;;  %v460_v26 = vmul.f32 %v1290_v18, %v1631_v13 }
  0xf7   : > { %v469_v33 = vmul.f32 %v1309_v21, %v1631_v13  ;;  %v461_v34 = vmul.f32 %v1293_v22, %v1631_v13  ;;  %v470_v37 = vmul.f32 %v1310_v29, %v1631_v13  ;;  %v462_v38 = vmul.f32 %v1294_v30, %v1631_v13 }
  0xf8   : > { %v500_v27 = vsel %vm475_vm4, %v467_v23, 0.0  ;;  %v476_v28 = vsel %vm475_vm4, %v459_v24, 0.0  ;;  %v503_v31 = vsel %vm475_vm4, %v468_v25, 0.0  ;;  %v479_v32 = vsel %vm475_vm4, %v460_v26, 0.0 }
  0xf9   : > { %501 = vadd.xlane.f32.xlu1 %v500_v27  ;;  %477 = vadd.xlane.f32.xlu0 %v476_v28  ;;  %v506_v39 = vsel %vm475_vm4, %v469_v33, 0.0  ;;  %v482_v40 = vsel %vm475_vm4, %v461_v34, 0.0  ;;  %v509_v43 = vsel %vm475_vm4, %v470_v37, 0.0  ;;  %v485_v44 = vsel %vm475_vm4, %v462_v38, 0.0 }
  0xfa   : > { %v471_v45 = vmul.f32 %v1313_v41, %v1631_v13  ;;  %v463_v46 = vmul.f32 %v1297_v42, %v1631_v13  ;;  %v472_v55 = vmul.f32 %v1314_v47, %v1631_v13  ;;  %v464_v56 = vmul.f32 %v1298_v48, %v1631_v13 }
  0xfb   : > { %v473_v61 = vmul.f32 %v1317_v51, %v1631_v13  ;;  %v465_v62 = vmul.f32 %v1301_v52, %v1631_v13  ;;  %v474_v1 = vmul.f32 %v1318_v57, %v1631_v13  ;;  %v466_v2 = vmul.f32 %v1302_v58, %v1631_v13 }
  0xfc   : > { %v512_v53 = vsel %vm475_vm4, %v471_v45, 0.0  ;;  %v488_v54 = vsel %vm475_vm4, %v463_v46, 0.0  ;;  %v515_v59 = vsel %vm475_vm4, %v472_v55, 0.0  ;;  %v491_v60 = vsel %vm475_vm4, %v464_v56, 0.0 }
  0xfd   : > { %504 = vadd.xlane.f32.xlu1 %v503_v31  ;;  %480 = vadd.xlane.f32.xlu0 %v479_v32  ;;  %v518_v63 = vsel %vm475_vm4, %v473_v61, 0.0  ;;  %v494_v0 = vsel %vm475_vm4, %v465_v62, 0.0  ;;  %v521_v3 = vsel %vm475_vm4, %v474_v1, 0.0  ;;  %v497_v4 = vsel %vm475_vm4, %v466_v2, 0.0  ;;  %v1277_v1 = vld [vmem:[%s1927_s0] ss:$0 sm:$0xff] }
  0xfe   : > { %v1734_v25 = vshrl.u32 %v524_v11, 7  ;;  %v555_v13 = vand.u32 127, %v524_v11  ;;  %v528_v38 = vstv %s1603_s29  ;;  %vm997_vm1 = vcmask (!%p1278_p6), 261120  }
  0xff   : > { %vm1145_vm2 = vcmask (!%p1278_p6), 392192  }
 0x100   : > { %v558_v28 = vsub.s32 %v555_v13, %v1734_v25  ;;  %v526_v33 = vadd.s32 8, %v1734_v25 }
 0x101   : > { %507 = vadd.xlane.f32.xlu1 %v506_v39  ;;  %483 = vadd.xlane.f32.xlu0 %v482_v40 }
 0x105   : > { %510 = vadd.xlane.f32.xlu1 %v509_v43  ;;  %486 = vadd.xlane.f32.xlu0 %v485_v44 }
 0x109   : > { %513 = vadd.xlane.f32.xlu1 %v512_v53  ;;  %489 = vadd.xlane.f32.xlu0 %v488_v54 }
 0x10d   : > { %516 = vadd.xlane.f32.xlu1 %v515_v59  ;;  %492 = vadd.xlane.f32.xlu0 %v491_v60  ;;  %v530_v59 = vadd.s32 %v528_v38, %v526_v33  ;;  %v529_v60 = vadd.s32 %v528_v38, %v1734_v25 }
 0x10f   : > { %vm537_vm12 = vcmp.ge.s32.totalorder %v530_v59, %v1277_v1  ;;  %vm536_vm13 = vcmp.ge.s32.totalorder %v529_v60, %v1277_v1 }
 0x111   : > { %519 = vadd.xlane.f32.xlu1 %v518_v63  ;;  %495 = vadd.xlane.f32.xlu0 %v494_v0 }
 0x115   : > { %522 = vadd.xlane.f32.xlu1 %v521_v3  ;;  %498 = vadd.xlane.f32.xlu0 %v497_v4 }
 0x186   : > { %v502_v5 = vpop.xlane.xlu1 %501  ;;  %v478_v6 = vpop.xlane.xlu0 %477 }
 0x187   : > { %v591_v43 = vrot.slane %v502_v5, %v558_v28  ;;  %v559_v44 = vrot.slane %v478_v6, %v558_v28 }
 0x18a   : > { %v505_v7 = vpop.xlane.xlu1 %504  ;;  %v481_v8 = vpop.xlane.xlu0 %480 }
 0x18b   : > { %v595_v34 = vrot.slane %v505_v7, %v558_v28  ;;  %v563_v37 = vrot.slane %v481_v8, %v558_v28 }
 0x18d   : > { %v634_v61 = vsel %vm620_vm5, %v595_v34, %v591_v43  ;;  %v621_v62 = vsel %vm620_vm5, %v563_v37, %v559_v44 }
 0x18e   : > { %v508_v9 = vpop.xlane.xlu1 %507  ;;  %v484_v10 = vpop.xlane.xlu0 %483 }
 0x18f   : > { %v599_v39 = vrot.slane %v508_v9, %v558_v28  ;;  %v567_v40 = vrot.slane %v484_v10, %v558_v28 }
 0x191   : > { %v635_v2 = vsel %vm622_vm6, %v599_v39, %v634_v61  ;;  %v623_v3 = vsel %vm622_vm6, %v567_v40, %v621_v62 }
 0x192   : > { %v511_v23 = vpop.xlane.xlu1 %510  ;;  %v487_v24 = vpop.xlane.xlu0 %486 }
 0x193   : > { %v603_v45 = vrot.slane %v511_v23, %v558_v28  ;;  %v571_v46 = vrot.slane %v487_v24, %v558_v28 }
 0x195   : > { %v636_v6 = vsel %vm624_vm7, %v603_v45, %v635_v2  ;;  %v625_v7 = vsel %vm624_vm7, %v571_v46, %v623_v3 }
 0x196   : > { %v514_v26 = vpop.xlane.xlu1 %513  ;;  %v490_v27 = vpop.xlane.xlu0 %489 }
 0x197   : > { %v607_v53 = vrot.slane %v514_v26, %v558_v28  ;;  %v575_v54 = vrot.slane %v490_v27, %v558_v28 }
 0x199   : > { %v637_v8 = vsel %vm626_vm8, %v607_v53, %v636_v6  ;;  %v627_v9 = vsel %vm626_vm8, %v575_v54, %v625_v7  ;;  %v649_v53 = vld [vmem:[#allocation3] sm:$0x1]  ;;  %v737_v7 = vsub.s32 1, %v1734_v25 }
 0x19a   : > { %v517_v31 = vpop.xlane.xlu1 %516  ;;  %v493_v32 = vpop.xlane.xlu0 %492 }
 0x19b   : > { %v611_v63 = vrot.slane %v517_v31, %v558_v28  ;;  %v579_v0 = vrot.slane %v493_v32, %v558_v28 }
 0x19d   : > { %v638_v23 = vsel %vm628_vm9, %v611_v63, %v637_v8  ;;  %v629_v24 = vsel %vm628_vm9, %v579_v0, %v627_v9  ;;  %v779_v9 = vsub.s32 7, %v1734_v25 }
 0x19e   : > { %v520_v55 = vpop.xlane.xlu1 %519  ;;  %v496_v56 = vpop.xlane.xlu0 %495 }
 0x19f   : > { %v615_v4 = vrot.slane %v520_v55, %v558_v28  ;;  %v583_v5 = vrot.slane %v496_v56, %v558_v28  ;;  %v1759_v55 = vsub.s32 0, %v1734_v25 }
 0x1a1   : > { %v639_v27 = vsel %vm630_vm10, %v615_v4, %v638_v23  ;;  %v631_v31 = vsel %vm630_vm10, %v583_v5, %v629_v24  ;;  %v744_v24 = vsub.s32 2, %v1734_v25 }
 0x1a2   : > { %v523_v10 = vpop.xlane.xlu1 %522  ;;  %v499_v11 = vpop.xlane.xlu0 %498 }
 0x1a3   : > { %v619_v13 = vrot.slane %v523_v10, %v558_v28  ;;  %v587_v26 = vrot.slane %v499_v11, %v558_v28 }
 0x1a5   : > { %v640_v32 = vsel %vm632_vm11, %v619_v13, %v639_v27  ;;  %v633_v33 = vsel %vm632_vm11, %v587_v26, %v631_v31  ;;  %v1535_v13 = vmov 0  }
 0x1a6   : > { %v644_v34 = vsel %vm537_vm12, -1e+30, %v640_v32  ;;  %v643_v37 = vsel %vm536_vm13, -1e+30, %v633_v33  ;;  %1452 = vset.pattern.permute.xlu1 %v1535_v13  ;;  %v751_v33 = vsub.s32 3, %v1734_v25 }
 0x1a7   : > { %648 = vst.msk [vmem:[%s645_s30 + $0x8] sm:$0xff] %vm646_vm14, %v644_v34  ;;  %v651_v38 = vsel %vm646_vm14, %v644_v34, -inf  ;;  %647 = vst.msk [vmem:[%s645_s30] sm:$0xff] %vm646_vm14, %v643_v37  ;;  %v650_v39 = vsel %vm646_vm14, %v643_v37, -inf }
 0x1a8   : > { %v652_v40 = vmax.f32 %v650_v39, %v651_v38 }
 0x1aa   : > { %v653_v43 = vrot.slane %v652_v40, 4 }
 0x1ac   : > { %v654_v44 = vmax.f32 %v652_v40, %v653_v43  ;;  %v758_v40 = vsub.s32 4, %v1734_v25 }
 0x1ae   : > { %v655_v28 = vrot.slane %v654_v44, 2  ;;  %v901_v49 = vld [vmem:[#allocation6 + $0x28] sm:$0xff] (!%p1278_p6) }
 0x1b0   : > { %v656_v45 = vmax.f32 %v654_v44, %v655_v28 }
 0x1b2   : > { %v657_v46 = vrot.slane %v656_v45, 1 }
 0x1b4   : > { %v658_v54 = vmax.f32 %v656_v45, %v657_v46  ;;  %v765_v46 = vsub.s32 5, %v1734_v25 }
 0x1b6   : > { %v659_v56 = vmax.f32 %v649_v53, %v658_v54  ;;  %v772_v54 = vsub.s32 6, %v1734_v25 }
 0x1b8   : > { %v660_v59 = vsub.f32 %v649_v53, %v659_v56  ;;  %889 = vst.msk [vmem:[#allocation3] sm:$0x1] %vm687_vm15, %v659_v56  ;;  %v667_v60 = vrot.slane %v659_v56, %v1759_v55 }
 0x1ba   : > { %v661_v61 = vmul.f32 1.442695, %v660_v59  ;;  %v669_v62 = vsub.f32 %v643_v37, %v667_v60  ;;  %v670_v63 = vsub.f32 %v644_v34, %v667_v60  ;;  %v675_v37 = vld [vmem:[#allocation4] sm:$0x1] }
 0x1bc   : > { %1454 = vpow2.f32 %v661_v61  ;;  %v671_v0 = vmul.f32 1.442695, %v669_v62  ;;  %v673_v1 = vmul.f32 1.442695, %v670_v63 }
 0x1be   : > { %1456 = vpow2.f32 %v671_v0 }
 0x1bf   : > { %1458 = vpow2.f32 %v673_v1 }
 0x1c6   : > { %v1455_v2 = vpop.eup %1454 }
 0x1c7   : > { %689 = vxpose.xlu0.b32.start.end [1/1] (short) (narrow) %v1455_v2, 8  ;;  %v676_v43 = vmul.f32 %v1455_v2, %v675_v37 }
 0x1c8   : > { %v1457_v3 = vpop.eup %1456 }
 0x1c9   : > { %v1459_v4 = vpop.eup %1458  ;;  %v731_v5 = vrot.slane %v1457_v3, %v1759_v55  ;;  %v677_v6 = vsel %vm646_vm14, %v1457_v3, 0.0  ;;  %v738_v23 = vrot.slane %v1457_v3, %v737_v7  ;;  %v745_v32 = vrot.slane %v1457_v3, %v744_v24 }
 0x1ca   : > { %v678_v8 = vsel %vm646_vm14, %v1459_v4, 0.0  ;;  %v836_v26 = vrot.slane %v1459_v4, %v779_v9  ;;  %v752_v39 = vrot.slane %v1457_v3, %v751_v33  ;;  %v759_v45 = vrot.slane %v1457_v3, %v758_v40 }
 0x1cb   : > { %733 = vbcast.lane.b32.xlu1 %v731_v5, 256  ;;  %v679_v10 = vadd.f32 %v678_v8, %v677_v6  ;;  %v766_v53 = vrot.slane %v1457_v3, %v765_v46  ;;  %v773_v56 = vrot.slane %v1457_v3, %v772_v54  ;;  %v780_v59 = vrot.slane %v1457_v3, %v779_v9 }
 0x1cc   : > { %v794_v60 = vrot.slane %v1459_v4, %v737_v7  ;;  %v801_v61 = vrot.slane %v1459_v4, %v744_v24  ;;  %v787_v62 = vrot.slane %v1459_v4, %v1759_v55  ;;  %v808_v63 = vrot.slane %v1459_v4, %v751_v33 }
 0x1cd   : > { %v680_v11 = vrot.slane %v679_v10, 4  ;;  %v815_v0 = vrot.slane %v1459_v4, %v758_v40  ;;  %v822_v1 = vrot.slane %v1459_v4, %v765_v46  ;;  %v829_v25 = vrot.slane %v1459_v4, %v772_v54 }
 0x1cf   : > { %v681_v27 = vadd.f32 %v680_v11, %v679_v10  ;;  %740 = vbcast.lane.b32.xlu1 %v738_v23, 256 }
 0x1d1   : > { %v682_v31 = vrot.slane %v681_v27, 2 }
 0x1d3   : > { %v683_v34 = vadd.f32 %v682_v31, %v681_v27  ;;  %747 = vbcast.lane.b32.xlu1 %v745_v32, 256 }
 0x1d5   : > { %v684_v38 = vrot.slane %v683_v34, 1 }
 0x1d7   : > { %v685_v44 = vadd.f32 %v684_v38, %v683_v34  ;;  %754 = vbcast.lane.b32.xlu1 %v752_v39, 256 }
 0x1d9   : > { %v686_v28 = vadd.f32 %v685_v44, %v676_v43 }
 0x1db   : > { %688 = vst.msk [vmem:[#allocation4] sm:$0x1] %vm687_vm15, %v686_v28  ;;  %761 = vbcast.lane.b32.xlu1 %v759_v45, 256 }
 0x1df   : > { %768 = vbcast.lane.b32.xlu1 %v766_v53, 256 }
 0x1e3   : > { %775 = vbcast.lane.b32.xlu1 %v773_v56, 256 }
 0x1e7   : > { %782 = vbcast.lane.b32.xlu1 %v780_v59, 256 }
 0x1eb   : > { %796 = vbcast.lane.b32.xlu1 %v794_v60, 256 }
 0x1ef   : > { %803 = vbcast.lane.b32.xlu1 %v801_v61, 256 }
 0x1f0   : > { %789 = vbcast.lane.b32.xlu0 %v787_v62, 256 }
 0x1f1   : > { %1453 = vset.pattern.permute.xlu0 %v1535_v13 }
 0x1f3   : > { %810 = vbcast.lane.b32.xlu1 %v808_v63, 256 }
 0x1f7   : > { %817 = vbcast.lane.b32.xlu1 %v815_v0, 256 }
 0x1fb   : > { %824 = vbcast.lane.b32.xlu1 %v822_v1, 256 }
 0x1ff   : > { %831 = vbcast.lane.b32.xlu1 %v829_v25, 256 }
 0x23d   : > { %v734_v3 = vpop.permute.xlu1 %733 }
 0x23e   : > { %v840_v24 = vmul.f32 %v1289_v16, %v734_v3 }
 0x240   : > { %v856_v31 = vsel %vm475_vm4, %v840_v24, 0.0  ;;  %v898_v24 = vld [vmem:[#allocation6 + $0x10] sm:$0xff] (!%p1278_p6) }
 0x241   : > { %v741_v5 = vpop.permute.xlu1 %740 }
 0x242   : > { %v841_v23 = vmul.f32 %v1290_v18, %v741_v5 }
 0x245   : > { %v748_v6 = vpop.permute.xlu1 %747 }
 0x246   : > { %v842_v4 = vmul.f32 %v1293_v22, %v748_v6  ;;  %v721_v6 = vld [vmem:[#allocation5] sm:$0xff] }
 0x247   : > { %v705_v2 = vpop.trf.xlu0 }
 0x248   : > { %724 = vperm.xlu1 %1452, %v705_v2   ;;  %v859_v32 = vsel %vm475_vm4, %v842_v4, 0.0  ;;  %v899_v4 = vld [vmem:[#allocation6 + $0x18] sm:$0xff] (!%p1278_p6) }
 0x249   : > { %v755_v7 = vpop.permute.xlu1 %754 }
 0x24a   : > { %v843_v27 = vmul.f32 %v1294_v30, %v755_v7 }
 0x24c   : > { %838 = vbcast.lane.b32.xlu1 %v836_v26, 256  ;;  %v857_v26 = vsel %vm475_vm4, %v841_v23, 0.0  ;;  %v861_v14 = vsel %vm475_vm4, %v843_v27, 0.0  ;;  %v897_v23 = vld [vmem:[#allocation6 + $0x8] sm:$0xff] (!%p1278_p6) }
 0x24d   : > { %v762_v8 = vpop.permute.xlu1 %761  ;;  %v858_v18 = vadd.f32 %v857_v26, %v856_v31 }
 0x24e   : > { %v844_v33 = vmul.f32 %v1297_v42, %v762_v8 }
 0x24f   : > { %v860_v22 = vadd.f32 %v859_v32, %v858_v18 }
 0x250   : > { %v863_v37 = vsel %vm475_vm4, %v844_v33, 0.0 }
 0x251   : > { %v769_v9 = vpop.permute.xlu1 %768  ;;  %v862_v30 = vadd.f32 %v861_v14, %v860_v22 }
 0x252   : > { %v845_v16 = vmul.f32 %v1298_v48, %v769_v9 }
 0x253   : > { %v864_v40 = vadd.f32 %v863_v37, %v862_v30 }
 0x254   : > { %v865_v39 = vsel %vm475_vm4, %v845_v16, 0.0 }
 0x255   : > { %v776_v10 = vpop.permute.xlu1 %775  ;;  %v866_v48 = vadd.f32 %v865_v39, %v864_v40  ;;  %v985_v39 = vld [vmem:[%s1931_s4 + $0x8] sm:$0xff] (!%p1278_p6) }
 0x256   : > { %v846_v20 = vmul.f32 %v1301_v52, %v776_v10 }
 0x258   : > { %v867_v43 = vsel %vm475_vm4, %v846_v20, 0.0 }
 0x259   : > { %v783_v11 = vpop.permute.xlu1 %782  ;;  %v868_v45 = vadd.f32 %v867_v43, %v866_v48  ;;  %v1536_v43 = vmov (!%p1278_p6), 0.0|0.0   ;;  %v987_v48 = vld [vmem:[%s1931_s4 + $0x18] sm:$0xff] (!%p1278_p6) }
 0x25a   : > { %v847_v42 = vmul.f32 %v1302_v58, %v783_v11  ;;  %v896_v11 = vld [vmem:[#allocation6] sm:$0xff] (!%p1278_p6)  ;;  %1398 = vmatprep.subr.bf16.mxu0 (!%p1278_p6), %v1536_v43  ;;  %1392 = vmatprep.subr.bf16.mxu1 (!%p1278_p6), %v1536_v43 }
 0x25c   : > { %v869_v28 = vsel %vm475_vm4, %v847_v42, 0.0  ;;  %v986_v42 = vld [vmem:[%s1931_s4 + $0x10] sm:$0xff] (!%p1278_p6) }
 0x25d   : > { %v797_v13 = vpop.permute.xlu1 %796  ;;  %v870_v46 = vadd.f32 %v869_v28, %v868_v45  ;;  %v994_v28 = vld [vmem:[%s1932_s5 + $0x8] sm:$0xff] (!%p1278_p6) }
 0x25e   : > { %v849_v53 = vmul.f32 %v1306_v17, %v797_v13  ;;  %v900_v13 = vld [vmem:[#allocation6 + $0x20] sm:$0xff] (!%p1278_p6) }
 0x260   : > { %v873_v58 = vsel %vm475_vm4, %v849_v53, 0.0 }
 0x261   : > { %v804_v34 = vpop.permute.xlu1 %803 }
 0x262   : > { %v790_v38 = vpop.permute.xlu0 %789  ;;  %v850_v56 = vmul.f32 %v1309_v21, %v804_v34 }
 0x263   : > { %v848_v36 = vmul.f32 %v1305_v15, %v790_v38  ;;  %v984_v38 = vld [vmem:[%s1931_s4] sm:$0xff] (!%p1278_p6) }
 0x264   : > { %v875_v60 = vsel %vm475_vm4, %v850_v56, 0.0 }
 0x265   : > { %v811_v44 = vpop.permute.xlu1 %810  ;;  %v871_v52 = vsel %vm475_vm4, %v848_v36, 0.0  ;;  %v1399_v36 = vpack.c.bf16 (!%p1278_p6), %v985_v39, %v984_v38 }
 0x266   : > { %v872_v54 = vadd.f32 %v871_v52, %v870_v46  ;;  %v851_v61 = vmul.f32 %v1310_v29, %v811_v44  ;;  %v993_v44 = vld [vmem:[%s1932_s5] sm:$0xff] (!%p1278_p6)  ;;  %v1402_v52 = vpack.c.bf16 (!%p1278_p6), %v987_v48, %v986_v42  ;;  %v996_v46 = vld [vmem:[%s1932_s5 + $0x18] sm:$0xff] (!%p1278_p6) }
 0x267   : > { %v1393_v45 = vpack.c.bf16 (!%p1278_p6), %v994_v28, %v993_v44  ;;  %1400 = vmatpush3.bf16.msra.mxu0 (!%p1278_p6), %v1399_v36 }
 0x268   : > { %v874_v59 = vadd.f32 %v873_v58, %v872_v54  ;;  %v877_v12 = vsel %vm475_vm4, %v851_v61, 0.0  ;;  %1401 = vmatprep.subr.bf16.mxu0 (!%p1278_p6), %v1536_v43  ;;  %v988_v54 = vld [vmem:[%s1931_s4 + $0x20] sm:$0xff] (!%p1278_p6) }
 0x269   : > { %v818_v50 = vpop.permute.xlu1 %817  ;;  %1394 = vmatpush3.bf16.msra.mxu1 (!%p1278_p6), %v1393_v45 }
 0x26a   : > { %v876_v62 = vadd.f32 %v875_v60, %v874_v59  ;;  %v852_v63 = vmul.f32 %v1313_v41, %v818_v50  ;;  %v989_v50 = vld [vmem:[%s1931_s4 + $0x28] sm:$0xff] (!%p1278_p6)  ;;  %1395 = vmatprep.subr.bf16.mxu1 (!%p1278_p6), %v1536_v43 }
 0x26b   : > { %1403 = vmatpush3.bf16.msra.mxu0 (!%p1278_p6), %v1402_v52 }
 0x26c   : > { %v878_v17 = vadd.f32 %v877_v12, %v876_v62  ;;  %v879_v1 = vsel %vm475_vm4, %v852_v63, 0.0  ;;  %v1405_v63 = vpack.c.bf16 (!%p1278_p6), %v989_v50, %v988_v54  ;;  %1404 = vmatprep.subr.bf16.mxu0 (!%p1278_p6), %v1536_v43 }
 0x26d   : > { %v825_v15 = vpop.permute.xlu1 %824 }
 0x26e   : > { %v853_v21 = vmul.f32 %v1314_v47, %v825_v15  ;;  %v880_v2 = vadd.f32 %v879_v1, %v878_v17  ;;  %v991_v1 = vld [vmem:[%s1931_s4 + $0x38] sm:$0xff] (!%p1278_p6) }
 0x26f   : > { %1406 = vmatpush3.bf16.msra.mxu0 (!%p1278_p6), %v1405_v63 }
 0x270   : > { %v881_v19 = vsel %vm475_vm4, %v853_v21, 0.0  ;;  %1407 = vmatprep.subr.bf16.mxu0 (!%p1278_p6), %v1536_v43 }
 0x271   : > { %v832_v0 = vpop.permute.xlu1 %831  ;;  %v882_v5 = vadd.f32 %v881_v19, %v880_v2  ;;  %v1537_v19 = vmov (!%p1278_p6), 0  }
 0x272   : > { %v854_v25 = vmul.f32 %v1317_v51, %v832_v0  ;;  %v894_v51 = vld [vmem:[#allocation4] sm:$0x1] (!%p1278_p6)  ;;  %v990_v0 = vld [vmem:[%s1931_s4 + $0x30] sm:$0xff] (!%p1278_p6) }
 0x273   : > { %1461 = vrcp.f32 (!%p1278_p6), %v894_v51 }
 0x274   : > { %v883_v29 = vsel %vm475_vm4, %v854_v25, 0.0 }
 0x275   : > { %v884_v8 = vadd.f32 %v883_v29, %v882_v5  ;;  %v1539_v5 = vmov (!%p1278_p6), 0.0  }
 0x276   : > { %1364 = vmatprep.mubr.msk.f32.mxu1 (!%p1278_p6), %vm1538_vm0, %v1539_v5  ;;  %1383 = vmatprep.mubr.msk.f32.mxu0 (!%p1278_p6), %vm1538_vm0, %v1539_v5 }
 0x27d   : > { %v1462_v30 = vpop.eup (!%p1278_p6), %1461 }
 0x27e   : > { %946 = vxpose.xlu0.b32.start.end [1/1] (short) (narrow) (!%p1278_p6), %v1462_v30, 8  ;;  %v931_v40 = vrot.slane (!%p1278_p6), %v1462_v30, %v1759_v55  ;;  %v995_v55 = vld [vmem:[%s1932_s5 + $0x10] sm:$0xff] (!%p1278_p6) }
 0x27f   : > { %v1396_v58 = vpack.c.bf16 (!%p1278_p6), %v996_v46, %v995_v55 }
 0x281   : > { %1397 = vmatpush3.bf16.msra.mxu1 (!%p1278_p6), %v1396_v58 }
 0x2a7   : > { %1460 = vset.pattern.permute.xlu0 (!%p1278_p6), %v1537_v19 }
 0x2c7   : > { %v725_v3 = vpop.permute.xlu1 %724 }
 0x2c8   : > { %v727_v35 = vmul.f32 %v725_v3, %v721_v6  ;;  %v1408_v3 = vpack.c.bf16 (!%p1278_p6), %v991_v1, %v990_v0 }
 0x2ca   : > { %1409 = vmatpush3.bf16.msra.mxu0 (!%p1278_p6), %v1408_v3 }
 0x2cb   : > { %v839_v41 = vpop.permute.xlu1 %838 }
 0x2cc   : > { %v855_v7 = vmul.f32 %v1318_v57, %v839_v41  ;;  %v1279_v57 = vld [vmem:[#allocation3] ss:$0 sm:$0xff] (!%p1278_p6)  ;;  %v992_v41 = vld [vmem:[%s1928_s1] sm:$0xff] (!%p1278_p6) }
 0x2cd   : > { %893 = sbr.rel (%p1278_p6) target bundleno = 1123 (0x463), region = 52  ;;  %v909_v26 = vsub.f32 (!%p1278_p6), %v896_v11, %v1279_v57  ;;  %v910_v27 = vsub.f32 (!%p1278_p6), %v897_v23, %v1279_v57  ;;  %v911_v31 = vsub.f32 (!%p1278_p6), %v898_v24, %v1279_v57  ;;  %v912_v32 = vsub.f32 (!%p1278_p6), %v899_v4, %v1279_v57  ;;  %1365 = vmatmul.mubr.msk.f32.vlgmr.msra.gmra.mrb[0].mxu1 (!%p1278_p6), %vm997_vm1, %v992_v41 }
 0x2ce   : > { %v885_v9 = vsel %vm475_vm4, %v855_v7, 0.0  ;;  %v913_v33 = vsub.f32 (!%p1278_p6), %v900_v13, %v1279_v57  ;;  %v914_v18 = vsub.f32 (!%p1278_p6), %v901_v49, %v1279_v57 }
 0x2cf   : > { %v886_v47 = vadd.f32 %v885_v9, %v884_v8  ;;  %v915_v14 = vmul.f32 (!%p1278_p6), 1.442695, %v909_v26  ;;  %v917_v16 = vmul.f32 (!%p1278_p6), 1.442695, %v910_v27  ;;  %v919_v22 = vmul.f32 (!%p1278_p6), 1.442695, %v911_v31 }
 0x2d0   : > { %v921_v34 = vmul.f32 (!%p1278_p6), 1.442695, %v912_v32  ;;  %v923_v37 = vmul.f32 (!%p1278_p6), 1.442695, %v913_v33  ;;  %v925_v20 = vmul.f32 (!%p1278_p6), 1.442695, %v914_v18 }
 0x2d1   : > { %v887_v10 = vadd.f32 %v886_v47, %v727_v35  ;;  %1463 = vpow2.f32 (!%p1278_p6), %v915_v14 }
 0x2d2   : > { %1465 = vpow2.f32 (!%p1278_p6), %v917_v16 }
 0x2d3   : > { %888 = vst.msk [vmem:[#allocation5] sm:$0xff] %vm475_vm4, %v887_v10  ;;  %1467 = vpow2.f32 (!%p1278_p6), %v919_v22 }
 0x2d4   : > { %1469 = vpow2.f32 %v921_v34 }
 0x2d5   : > { %1471 = vpow2.f32 %v923_v37 }
 0x2d6   : > { %1473 = vpow2.f32 %v925_v20 }
 0x2da   : > { %v945_v6 = vld [vmem:[#allocation5] sm:$0xff] }
 0x2db   : > { %v1464_v53 = vpop.eup %1463 }
 0x2dc   : > { %v1466_v56 = vpop.eup %1465  ;;  %v933_v59 = vmul.f32 %v1464_v53, %v931_v40 }
 0x2dd   : > { %v1468_v15 = vpop.eup %1467  ;;  %v934_v60 = vmul.f32 %v1466_v56, %v931_v40 }
 0x2de   : > { %v1470_v61 = vpop.eup %1469  ;;  %v935_v62 = vmul.f32 %v1468_v15, %v931_v40  ;;  %939 = vst.msk [vmem:[%s1934_s7] sm:$0xff] %vm646_vm14, %v933_v59 }
 0x2df   : > { %v1472_v12 = vpop.eup %1471  ;;  %v936_v17 = vmul.f32 %v1470_v61, %v931_v40  ;;  %940 = vst.msk [vmem:[%s1934_s7 + $0x8] sm:$0xff] %vm646_vm14, %v934_v60 }
 0x2e0   : > { %v1474_v21 = vpop.eup %1473  ;;  %v937_v25 = vmul.f32 %v1472_v12, %v931_v40  ;;  %941 = vst.msk [vmem:[%s1934_s7 + $0x10] sm:$0xff] %vm646_vm14, %v935_v62 }
 0x2e1   : > { %v938_v2 = vmul.f32 %v1474_v21, %v931_v40  ;;  %942 = vst.msk [vmem:[%s1934_s7 + $0x18] sm:$0xff] %vm646_vm14, %v936_v17 }
 0x2e2   : > { %943 = vst.msk [vmem:[%s1934_s7 + $0x20] sm:$0xff] %vm646_vm14, %v937_v25 }
 0x2e3   : > { %944 = vst.msk [vmem:[%s1934_s7 + $0x28] sm:$0xff] %vm646_vm14, %v938_v2 }
 0x2fe   : > { %v962_v29 = vpop.trf.xlu0 }
 0x2ff   : > { %980 = vperm.xlu0 %1460, %v962_v29  }
 0x37e   : > { %v981_v7 = vpop.permute.xlu0 %980 }
 0x37f   : > { %v983_v8 = vmul.f32 %v981_v7, %v945_v6 }
 0x381   : > { %1384 = vmatmul.mubr.msk.f32.vlgmr.msra.gmra.mrb[0].mxu0 %vm475_vm4, %v983_v8 }
 0x3a0   : > { %v1067_v9 = vpop.f32.mrb[0].mxu1 }
 0x3a1   : > { %v1366_v35 = vpop.f32.mrb[1].mxu1 }
 0x454   : > { %v1140_v47 = vpop.f32.mrb[0].mxu0 }
 0x455   : > { %v1141_v10 = vadd.f32 %v1140_v47, %v1067_v9  ;;  %v1385_v51 = vpop.f32.mrb[1].mxu0 }
 0x457   : > { %1475 = vtanh.f32 %v1141_v10 }
 0x461   : > { %v1476_v11 = vpop.eup %1475 }
 0x462   : > { %1146 = vst.msk [vmem:[#allocation7] sm:$0xff] %vm1145_vm2, %v1476_v11 }
 0x463 PF: > { %p1892_p7 = scmp.eq.s32.totalorder %s1266_s27, 2  ;;  %s1540_s29 = smov [#allocation7]  }
 0x464   : > { %s1160_s8 = sshll.u32 %s1540_s29, 4  ;;  %s1161_s8 = int_to_ptr.vmem [resolvable:$true] %s1160_s8 }
 0x465   : > { %s1477_s9 = scalar_lea.vmem %s1161_s8, 128  ;;  %p1484_p11 = scmp.lt.s32.totalorder %s1161_s8, %s1161_s8 }
 0x466   : > { %p1478_p8 = scmp.ne.s32.totalorder %s1161_s8, %s1477_s9  ;;  %p1485_p12 = scmp.lt.s32.totalorder %s1477_s9, %s1477_s9 }
 0x468   : > { %p1479_p9 = pnand %p1478_p8, %p1892_p7  ;;  %p1486_p13 = por %p1485_p12, %p1484_p11 }
 0x46a   : > { %p1480_p10 = pneg %p1479_p9 }
 0x46c   : > { %p1487_p0 = pnand %p1486_p13, %p1480_p10 }
 0x46e   : > { %1490 = shalt.err (!%p1487_p0)
}
 0x46f   : > { %s1491_s27 = scalar_lea.hbm %s1933_s6, 128 }
 0x470   : > { %p1492_p1 = scmp.ne.s32.totalorder %s1933_s6, %s1491_s27  ;;  %p1497_p4 = scmp.lt.u32.totalorder %s1491_s27, %s1933_s6 }
 0x472   : > { %p1493_p2 = pnand %p1492_p1, %p1892_p7 }
 0x474   : > { %p1494_p3 = pneg %p1493_p2 }
 0x476   : > { %p1499_p5 = pnand %p1497_p4, %p1494_p3 }
 0x478   : > { %1502 = shalt.err (!%p1499_p5)
}
 0x479   : > { %1412 = dma.vmem_to_hbm [thread:$0]  (%p1892_p7), %s1161_s8, 128, %s1933_s6, [#allocation8]  }
 0x47a   : > { %1516 = dma.done.wait (%p1892_p7), [#allocation8], 128  }
 0x47b   : > { %1518 = vsyncadd (%p1892_p7), [#allocation8], 4294967168 }
 0x47c PF: > { %s19_s26 = sadd.s32 1, %s1529_s26   ;;  %s1936_s24 = smov %s1525_s25 }
 0x47d   : > { %p16_p6 = scmp.ge.s32.totalorder %s19_s26, 5   ;;  %s1937_s25 = smov %s1939_s28 }
 0x47f   :  { %18 = sbr.rel (!%p16_p6) target bundleno = 2 (0x2), region = 99 }
 0x486   :  { %1183 = vsyncpa [#allocation8], 1 }
 0x487   :  { %1185 = vsyncpa [#allocation8 + $0x1], 1 }

</bundles_post_ra>
